<compile_context>
chip_gen: v6e
topology: v6e:2x2x1
jax: 0.10.0
libtpu: 0.0.40
codegen_flags: <defaults>
</compile_context>

<pallas_src>
import functools

import jax
import jax.numpy as jnp
from jax.experimental import pallas as pl
from jax.experimental.pallas import tpu as pltpu

EPS = 1e-5  # nn.LayerNorm default

# Safe scoped-VMEM ceiling across generations: below v7x's 64 MiB physical
# VMEM (leaves headroom for compiler-internal scratch), far below v5e/v6e's
# 128 MiB, and above the 16/32 MiB scoped defaults that would otherwise block
# large row tiles.
_VMEM_BUDGET = 48 * 1024 * 1024


def prenorm_kernel(x_ref, gamma_ref, beta_ref, w_ref, fb_ref, o_ref):
    # x_ref: (bm, D) rows; gamma/beta/fb: (1, D) f32; w_ref: (D, D) bf16.
    x = x_ref[...].astype(jnp.float32)

    # --- LayerNorm over last dim, single pass over x (biased variance, like
    # PyTorch).  mean and mean(x^2) have no data dependency, so the two XLU
    # reduces overlap; no (bm, D) `centered` temporary survives the reduce.
    mean = jnp.mean(x, axis=-1, keepdims=True)
    mean_sq = jnp.mean(x * x, axis=-1, keepdims=True)
    var = mean_sq - mean * mean
    inv = jax.lax.rsqrt(var + EPS)

    gamma = gamma_ref[...]                      # (1, D), broadcasts over rows
    beta = beta_ref[...]

    # Fused normalize + affine; single cast to bf16 for the MXU.
    y = ((x - mean) * (inv * gamma) + beta).astype(jnp.bfloat16)

    # --- fn: Linear(D, D): y @ W_t + b, f32 accumulation on the MXU.
    out = jnp.dot(y, w_ref[...], preferred_element_type=jnp.float32)
    out = out + fb_ref[...]

    o_ref[...] = out.astype(o_ref.dtype)


def _vmem_bytes(bm, D, in_itemsize, out_itemsize):
    """Rough per-step VMEM footprint (double-buffered tiles + resident params
    + in-body live temporaries)."""
    tiles = 2 * bm * D * in_itemsize + 2 * bm * D * out_itemsize
    resident = 2 * (D * D * 2 + 3 * D * 4)      # bf16 W + f32 gamma/beta/bias
    body = bm * D * (4 + 2 + 4)                 # f32 x, bf16 y, f32 acc
    return tiles + resident + body


def _pick_block_m(M, D, in_itemsize, out_itemsize):
    """Largest row tile (multiple of 256 preferred for MXU M-fill, minimum
    multiple of 16 for bf16 sublane packing) that fits the VMEM budget and
    does not exceed the rounded-up row count."""
    m_cap = max(16, ((M + 15) // 16) * 16)
    for bm in (1024, 512, 256, 128, 64, 32, 16):
        if bm <= m_cap and _vmem_bytes(bm, D, in_itemsize, out_itemsize) <= _VMEM_BUDGET:
            return bm
    return 16


@functools.partial(jax.jit, static_argnames=("block_m", "out_dtype"))
def prenorm(x, gamma, beta, w_t, fn_bias, *, block_m=None, out_dtype=None):
    """PreNorm(LayerNorm(D) -> Linear(D, D)) on x of shape (B, S, D).

    w_t is the Linear weight stored transposed, shape (D_in, D_out); callers
    should hold it in bf16 for call-to-call determinism (it is cast to bf16
    for the MXU either way).
    """
    B, S, D = x.shape
    M = B * S
    out_dtype = x.dtype if out_dtype is None else out_dtype
    in_sz = jnp.dtype(x.dtype).itemsize
    out_sz = jnp.dtype(out_dtype).itemsize

    x2 = x.reshape(M, D)
    gamma = gamma.reshape(1, D).astype(jnp.float32)
    beta = beta.reshape(1, D).astype(jnp.float32)
    fn_bias = fn_bias.reshape(1, D).astype(jnp.float32)
    w_bf16 = w_t.astype(jnp.bfloat16)           # resident, constant index_map

    if block_m is None:
        bm = _pick_block_m(M, D, in_sz, out_sz)
    else:
        m_cap = max(16, ((M + 15) // 16) * 16)
        bm = max(16, (min(block_m, m_cap) // 16) * 16)

    grid_m = pl.cdiv(M, bm)  # ragged last tile: OOB rows are dropped on writeback

    vmem_limit = int(min(_VMEM_BUDGET,
                         max(int(1.5 * _vmem_bytes(bm, D, in_sz, out_sz)),
                             16 * 1024 * 1024)))

    cost = pl.CostEstimate(
        flops=2 * M * D * D + 8 * M * D,
        transcendentals=M,                      # one rsqrt per row
        bytes_accessed=M * D * (in_sz + out_sz) + D * D * 2 + 3 * D * 4,
    )

    out = pl.pallas_call(
        prenorm_kernel,
        out_shape=jax.ShapeDtypeStruct((M, D), out_dtype),
        grid_spec=pltpu.PrefetchScalarGridSpec(
            num_scalar_prefetch=0,
            grid=(grid_m,),
            in_specs=[
                pl.BlockSpec((bm, D), lambda i: (i, 0)),   # x rows
                pl.BlockSpec((1, D), lambda i: (0, 0)),    # gamma (resident)
                pl.BlockSpec((1, D), lambda i: (0, 0)),    # beta  (resident)
                pl.BlockSpec((D, D), lambda i: (0, 0)),    # W_t   (resident, bf16)
                pl.BlockSpec((1, D), lambda i: (0, 0)),    # fn bias (resident)
            ],
            out_specs=pl.BlockSpec((bm, D), lambda i: (i, 0)),
        ),
        compiler_params=pltpu.CompilerParams(
            dimension_semantics=("parallel",),
            vmem_limit_bytes=vmem_limit,
        ),
        cost_estimate=cost,
    )(x2, gamma, beta, w_bf16, fn_bias)

    return out.reshape(B, S, D)


# ---------------------------------------------------------------------------
# References
# ---------------------------------------------------------------------------
def prenorm_ref_f32(x, gamma, beta, w_t, fn_bias):
    """Pure-f32, two-pass PyTorch-equivalent reference."""
    xf = x.astype(jnp.float32)
    mean = jnp.mean(xf, axis=-1, keepdims=True)
    var = jnp.mean((xf - mean) ** 2, axis=-1, keepdims=True)
    y = (xf - mean) * jax.lax.rsqrt(var + EPS)
    y = y * gamma.reshape(-1).astype(jnp.float32) + beta.reshape(-1).astype(jnp.float32)
    out = y @ w_t.astype(jnp.float32) + fn_bias.reshape(-1).astype(jnp.float32)
    return out.astype(x.dtype)


def prenorm_ref_matched(x, gamma, beta, w_t, fn_bias):
    """Reference matching the kernel's arithmetic (one-pass var, bf16 MXU)."""
    xf = x.astype(jnp.float32)
    mean = jnp.mean(xf, axis=-1, keepdims=True)
    var = jnp.mean(xf * xf, axis=-1, keepdims=True) - mean * mean
    g = gamma.reshape(-1).astype(jnp.float32)
    b = beta.reshape(-1).astype(jnp.float32)
    y = ((xf - mean) * (jax.lax.rsqrt(var + EPS) * g) + b).astype(jnp.bfloat16)
    out = jnp.dot(y, w_t.astype(jnp.bfloat16), preferred_element_type=jnp.float32)
    return (out + fn_bias.reshape(-1).astype(jnp.float32)).astype(x.dtype)


if __name__ == "__main__":
    # TimeSformer-like small shape: S = 1 cls token + 8x8 patches = 65, so
    # M = B*S = 130 is NOT a multiple of the row tile -> exercises the
    # ragged-last-tile path (no host pad / slice).
    B, S, D = 2, 65, 128

    key = jax.random.PRNGKey(0)
    kx, kw, kb, kg, kbe = jax.random.split(key, 5)

    x = jax.random.normal(kx, (B, S, D), dtype=jnp.float32)
    gamma = 1.0 + 0.1 * jax.random.normal(kg, (D,), dtype=jnp.float32)
    beta = 0.1 * jax.random.normal(kbe, (D,), dtype=jnp.float32)
    # fn = Linear(D, D): weight stored transposed (in, out), held in bf16.
    w_t = (jax.random.normal(kw, (D, D), dtype=jnp.float32)
           * (1.0 / jnp.sqrt(D))).astype(jnp.bfloat16)
    fn_bias = jax.random.normal(kb, (D,), dtype=jnp.float32) * 0.01

    # Auto-picked row tile (128 here -> 2 grid steps, second one ragged).
    out = jax.block_until_ready(prenorm(x, gamma, beta, w_t, fn_bias))
    assert out.shape == (B, S, D) and out.dtype == x.dtype

    ref_matched = prenorm_ref_matched(x, gamma, beta, w_t, fn_bias)
    assert jnp.allclose(out, ref_matched, atol=1e-3, rtol=1e-3), \
        "mismatch vs arithmetic-matched reference"

    ref_f32 = prenorm_ref_f32(x, gamma, beta, w_t, fn_bias)
    assert jnp.allclose(out, ref_f32, atol=5e-2, rtol=5e-2), \
        "mismatch vs f32 PyTorch-equivalent reference"

    # Explicit smaller tile (more pipeline steps) must agree too.
    out_small = jax.block_until_ready(
        prenorm(x, gamma, beta, w_t, fn_bias, block_m=64))
    assert jnp.allclose(out_small, ref_matched, atol=1e-3, rtol=1e-3), \
        "mismatch with block_m=64"

    # bf16 output path (halves store bytes in the HBM-bound regime).
    out_bf16 = jax.block_until_ready(
        prenorm(x, gamma, beta, w_t, fn_bias, out_dtype=jnp.bfloat16))
    assert out_bf16.dtype == jnp.bfloat16
    assert jnp.allclose(out_bf16.astype(jnp.float32),
                        ref_matched.astype(jnp.float32),
                        atol=2e-2, rtol=2e-2), "mismatch for bf16 output"

    print("KERNEL_OK")
</pallas_src>

<mosaic_0001>
module attributes {stable_mosaic.version = 11 : i64} {
  func.func @prenorm_kernel(%arg0: i32, %arg1: memref<128x128xf32, #tpu.memory_space<vmem>>, %arg2: memref<1x128xf32, #tpu.memory_space<vmem>>, %arg3: memref<1x128xf32, #tpu.memory_space<vmem>>, %arg4: memref<128x128xbf16, #tpu.memory_space<vmem>>, %arg5: memref<1x128xf32, #tpu.memory_space<vmem>>, %arg6: memref<128x128xf32, #tpu.memory_space<vmem>>) attributes {dimension_semantics = [#tpu.dimension_semantics<parallel>], iteration_bounds = array<i64: 2>, scalar_prefetch = 0 : i64, scratch_operands = 0 : i64, tpu.core_type = #tpu.core_type<tc>, window_params = [{transform_indices = @transform_0, window_bounds = array<i64: 128, 128>}, {pipeline_mode = #tpu.pipeline_mode<synchronous>, transform_indices = @transform_1, window_bounds = array<i64: 1, 128>}, {pipeline_mode = #tpu.pipeline_mode<synchronous>, transform_indices = @transform_2, window_bounds = array<i64: 1, 128>}, {pipeline_mode = #tpu.pipeline_mode<synchronous>, transform_indices = @transform_3, window_bounds = array<i64: 128, 128>}, {pipeline_mode = #tpu.pipeline_mode<synchronous>, transform_indices = @transform_4, window_bounds = array<i64: 1, 128>}, {transform_indices = @transform_5, window_bounds = array<i64: 128, 128>}]} {
    %c0 = arith.constant 0 : index
    %c0_0 = arith.constant 0 : index
    %0 = vector.load %arg1[%c0, %c0_0] : memref<128x128xf32, #tpu.memory_space<vmem>>, vector<128x128xf32>
    %cst = arith.constant dense<0.000000e+00> : vector<128xf32>
    %1 = vector.multi_reduction <add>, %0, %cst [1] : vector<128x128xf32> to vector<128xf32>
    %2 = vector.shape_cast %1 : vector<128xf32> to vector<128x1xf32>
    %cst_1 = arith.constant 1.280000e+02 : f32
    %3 = vector.broadcast %cst_1 : f32 to vector<128x1xf32>
    %4 = arith.divf %2, %3 : vector<128x1xf32>
    %5 = arith.mulf %0, %0 : vector<128x128xf32>
    %cst_2 = arith.constant dense<0.000000e+00> : vector<128xf32>
    %6 = vector.multi_reduction <add>, %5, %cst_2 [1] : vector<128x128xf32> to vector<128xf32>
    %7 = vector.shape_cast %6 : vector<128xf32> to vector<128x1xf32>
    %cst_3 = arith.constant 1.280000e+02 : f32
    %8 = vector.broadcast %cst_3 : f32 to vector<128x1xf32>
    %9 = arith.divf %7, %8 : vector<128x1xf32>
    %10 = arith.mulf %4, %4 : vector<128x1xf32>
    %11 = arith.subf %9, %10 : vector<128x1xf32>
    %cst_4 = arith.constant 9.99999974E-6 : f32
    %12 = vector.broadcast %cst_4 : f32 to vector<128x1xf32>
    %13 = arith.addf %11, %12 : vector<128x1xf32>
    %14 = math.rsqrt %13 : vector<128x1xf32>
    %c0_5 = arith.constant 0 : index
    %c0_6 = arith.constant 0 : index
    %15 = vector.load %arg2[%c0_5, %c0_6] : memref<1x128xf32, #tpu.memory_space<vmem>>, vector<1x128xf32>
    %c0_7 = arith.constant 0 : index
    %c0_8 = arith.constant 0 : index
    %16 = vector.load %arg3[%c0_7, %c0_8] : memref<1x128xf32, #tpu.memory_space<vmem>>, vector<1x128xf32>
    %17 = vector.broadcast %4 : vector<128x1xf32> to vector<128x128xf32>
    %18 = arith.subf %0, %17 : vector<128x128xf32>
    %19 = vector.broadcast %14 : vector<128x1xf32> to vector<128x128xf32>
    %20 = vector.broadcast %15 : vector<1x128xf32> to vector<128x128xf32>
    %21 = arith.mulf %19, %20 : vector<128x128xf32>
    %22 = arith.mulf %18, %21 : vector<128x128xf32>
    %23 = vector.broadcast %16 : vector<1x128xf32> to vector<128x128xf32>
    %24 = arith.addf %22, %23 : vector<128x128xf32>
    %25 = arith.truncf %24 : vector<128x128xf32> to vector<128x128xbf16>
    %c0_9 = arith.constant 0 : index
    %c0_10 = arith.constant 0 : index
    %26 = vector.load %arg4[%c0_9, %c0_10] : memref<128x128xbf16, #tpu.memory_space<vmem>>, vector<128x128xbf16>
    %cst_11 = arith.constant dense<0.000000e+00> : vector<128x128xf32>
    %27 = tpu.matmul %25, %26, %cst_11 {dimension_numbers = #tpu.dot_dimension_numbers<[1], [0], [0], [1], [0, 0, 1, 1], [], []>} : vector<128x128xbf16>, vector<128x128xbf16>, vector<128x128xf32> -> vector<128x128xf32>
    %c0_12 = arith.constant 0 : index
    %c0_13 = arith.constant 0 : index
    %28 = vector.load %arg5[%c0_12, %c0_13] : memref<1x128xf32, #tpu.memory_space<vmem>>, vector<1x128xf32>
    %29 = vector.broadcast %28 : vector<1x128xf32> to vector<128x128xf32>
    %30 = arith.addf %27, %29 : vector<128x128xf32>
    %c0_14 = arith.constant 0 : index
    %c0_15 = arith.constant 0 : index
    %31 = vector.load %arg6[%c0_14, %c0_15] : memref<128x128xf32, #tpu.memory_space<vmem>>, vector<128x128xf32>
    tpu.vector_store %arg6[%c0_14, %c0_15], %30 {strides = array<i32>} : memref<128x128xf32, #tpu.memory_space<vmem>>, vector<128x128xf32>,
    return
  }
  func.func @transform_0(%arg0: i32) -> (i32, i32) {
    %c0_i32 = arith.constant 0 : i32
    %c0_i32_0 = arith.constant 0 : i32
    return %arg0, %c0_i32 : i32, i32
  }
  func.func @transform_1(%arg0: i32) -> (i32, i32) {
    %c0_i32 = arith.constant 0 : i32
    %c0_i32_0 = arith.constant 0 : i32
    %c0_i32_1 = arith.constant 0 : i32
    return %c0_i32, %c0_i32_0 : i32, i32
  }
  func.func @transform_2(%arg0: i32) -> (i32, i32) {
    %c0_i32 = arith.constant 0 : i32
    %c0_i32_0 = arith.constant 0 : i32
    %c0_i32_1 = arith.constant 0 : i32
    return %c0_i32, %c0_i32_0 : i32, i32
  }
  func.func @transform_3(%arg0: i32) -> (i32, i32) {
    %c0_i32 = arith.constant 0 : i32
    %c0_i32_0 = arith.constant 0 : i32
    %c0_i32_1 = arith.constant 0 : i32
    return %c0_i32, %c0_i32_0 : i32, i32
  }
  func.func @transform_4(%arg0: i32) -> (i32, i32) {
    %c0_i32 = arith.constant 0 : i32
    %c0_i32_0 = arith.constant 0 : i32
    %c0_i32_1 = arith.constant 0 : i32
    return %c0_i32, %c0_i32_0 : i32, i32
  }
  func.func @transform_5(%arg0: i32) -> (i32, i32) {
    %c0_i32 = arith.constant 0 : i32
    %c0_i32_0 = arith.constant 0 : i32
    return %arg0, %c0_i32 : i32, i32
  }
}

</mosaic_0001>

<bundles_post_ra>
// kernel: prenorm.1
= control target key start
LH: loop header
LB: loop body
LE: loop exit
PB: predicated region body
PF: predicated region fallthrough
CT: control target
= control target key end

     0   :  { %s1334_s18 = smov 0   ;;  %s1336_s19 = smov 0   ;;  %s1753_s0 = inlined_call_operand.vmem [shape: f32[130,128], index: 0, kind: input, shape index: {}]   ;;  %s1754_s1 = inlined_call_operand.vmem [shape: f32[1,128], index: 1, kind: input, shape index: {}]   ;;  %s1755_s2 = inlined_call_operand.vmem [shape: f32[1,128], index: 2, kind: input, shape index: {}]   ;;  %s1756_s3 = inlined_call_operand.vmem [shape: bf16[128,128], index: 3, kind: input, shape index: {}]   ;;  %s1757_s4 = inlined_call_operand.vmem [shape: f32[1,128], index: 4, kind: input, shape index: {}]   ;;  %s1758_s5 = inlined_call_operand.vmem [shape: f32[130,128], index: 5, kind: output, shape index: {}]  }
   0x1   :  { %s1338_s20 = smov 0  }
   0x2 LB: > { %s1347_s21 = sadd.s32 4294967295, %s1270_s20   ;;  %s1349_s22 = sadd.s32 1, %s1270_s20   ;;  %s1270_s20 = sphi %s1338_s20, %s1765_s20   ;;  %s1266_s19 = sphi %s1336_s19, %s1764_s19   ;;  %s1262_s18 = sphi %s1334_s18, %s1763_s18  }
   0x3   : > { %s129_s23 = ssub.s32 %s1270_s20, %s1349_s22  ;;  %s132_s24 = sadd.s32 1, %s1266_s19 }
   0x4   : > { %p130_p0 = scmp.eq.s32.totalorder %s129_s23, 0  ;;  %p142_p1 = scmp.ne.s32.totalorder %s1266_s19, %s1262_s18 }
   0x5   : > { %p143_p2 = scmp.eq.s32.totalorder %s1347_s21, 1  ;;  %p989_p3 = scmp.ge.s32.totalorder %s1270_s20, 1 }
   0x6   : > { %s1357_s25 = scalar_select %p130_p0, %s1266_s19, %s132_s24  }
   0x7   : > { %p1359_p4 = por %p143_p2, %p142_p1  ;;  %p196_p5 = scmp.lt.s32.totalorder %s1270_s20, 3 }
   0x9   : > { %p197_p6 = pnand %p989_p3, %p196_p5 }
   0xa   : > { %s1364_s27 = sshll.u32 (!%p197_p6), %s1347_s21, 4  ;;  %s224_s10 = sand.u32 (!%p197_p6), 1, %s1262_s18  }
   0xb   : > { %200 = sbr.rel (%p197_p6) target bundleno = 491 (0x1eb), region = 40  ;;  %p232_p7 = scmp.lt.s32.totalorder (!%p197_p6), %s1364_s27, 16 }
   0xc   : > { %s990_s11 = sshll.u32 (!%p197_p6), %s224_s10, 7 }
   0xd   : > { %s1635_s14 = scalar_lea.vmem (!%p197_p6), [#allocation2], %s990_s11  }
  0x10   : > { %s233_s28 = scalar_select %p232_p7, %s1364_s27, 16  ;;  %v1176_v18 = vld [vmem:[%s1756_s3 + $0x38] sm:$0xff]   ;;  %v1177_v21 = vld [vmem:[%s1756_s3 + $0x30] sm:$0xff]   ;;  %v1178_v24 = vld [vmem:[%s1756_s3 + $0x28] sm:$0xff]  }
  0x11   : > { %1040 = vmatprep.subr.bf16.mxu0 %v1176_v18  ;;  %1072 = vmatprep.subr.bf16.mxu1 %v1176_v18  ;;  %v1179_v27 = vld [vmem:[%s1756_s3 + $0x20] sm:$0xff]   ;;  %v1180_v30 = vld [vmem:[%s1756_s3 + $0x18] sm:$0xff]   ;;  %v1181_v33 = vld [vmem:[%s1756_s3 + $0x10] sm:$0xff]   ;;  %s718_s18 = ssub.s32 (%p1359_p4), 17, %s1364_s27  ;;  %s1021_s15 = sshll.u32 (%p1359_p4), %s1347_s21, 7 }
  0x12   : > { %s992_s29 = sshll.u32 %s233_s28, 3  ;;  %1041 = vmatpush3.bf16.msra.mxu0 %v1176_v18  ;;  %1080 = vmatpush3.bf16.msra.mxu1 %v1176_v18  ;;  %v1182_v36 = vld [vmem:[%s1756_s3 + $0x8] sm:$0xff]   ;;  %v1183_v39 = vld [vmem:[%s1756_s3] sm:$0xff]   ;;  %p719_p8 = scmp.lt.s32.totalorder (%p1359_p4), %s718_s18, 16 }
  0x13   : > { %s1371_s7 = scalar_lea.vmem %s1753_s0, %s992_s29  ;;  %1042 = vmatprep.subr.bf16.mxu0 %v1177_v21  ;;  %1073 = vmatprep.subr.bf16.mxu1 %v1177_v21  ;;  %s1660_s20 = scalar_lea.vmem (%p1359_p4), %s1758_s5, %s1021_s15  }
  0x14   : > { %v1374_v0 = vld [vmem:[%s1371_s7 + $0x40] sm:$0xff]  ;;  %v1382_v2 = vld [vmem:[%s1371_s7 + $0x48] sm:$0xff]  ;;  %v1390_v4 = vld [vmem:[%s1371_s7 + $0x18] sm:$0xff] }
  0x15   : > { %v1377_v1 = vld [vmem:[%s1371_s7] sm:$0xff]  ;;  %279 = vadd.xlane.f32.xlu1 %v1374_v0  ;;  %v1385_v3 = vld [vmem:[%s1371_s7 + $0x8] sm:$0xff]  ;;  %v1393_v5 = vld [vmem:[%s1371_s7 + $0x10] sm:$0xff]  ;;  %v321_v10 = vmul.f32 %v1382_v2, %v1382_v2  ;;  %v320_v11 = vmul.f32 %v1374_v0, %v1374_v0  ;;  %v315_v12 = vmul.f32 %v1390_v4, %v1390_v4 }
  0x16   : > { %263 = vadd.xlane.f32.xlu0 %v1377_v1  ;;  %v1398_v6 = vld [vmem:[%s1371_s7 + $0x58] sm:$0xff]  ;;  %v1401_v7 = vld [vmem:[%s1371_s7 + $0x50] sm:$0xff]  ;;  %v313_v8 = vmul.f32 %v1385_v3, %v1385_v3  ;;  %v312_v9 = vmul.f32 %v1377_v1, %v1377_v1  ;;  %v314_v13 = vmul.f32 %v1393_v5, %v1393_v5  ;;  %v1422_v16 = vld [vmem:[%s1371_s7 + $0x28] sm:$0xff]  ;;  %1043 = vmatpush3.bf16.msra.mxu0 %v1177_v21 }
  0x17   : > { %v323_v14 = vmul.f32 %v1398_v6, %v1398_v6  ;;  %v322_v15 = vmul.f32 %v1401_v7, %v1401_v7  ;;  %v1425_v17 = vld [vmem:[%s1371_s7 + $0x20] sm:$0xff]  ;;  %v1433_v19 = vld [vmem:[%s1371_s7 + $0x68] sm:$0xff]  ;;  %v1444_v22 = vld [vmem:[%s1371_s7 + $0x38] sm:$0xff]  ;;  %1081 = vmatpush3.bf16.msra.mxu1 %v1177_v21  ;;  %1044 = vmatprep.subr.bf16.mxu0 %v1178_v24  ;;  %v317_v28 = vmul.f32 %v1422_v16, %v1422_v16 }
  0x18   : > { %v1436_v20 = vld [vmem:[%s1371_s7 + $0x60] sm:$0xff]  ;;  %v1447_v23 = vld [vmem:[%s1371_s7 + $0x30] sm:$0xff]  ;;  %1074 = vmatprep.subr.bf16.mxu1 %v1178_v24  ;;  %v1455_v25 = vld [vmem:[%s1371_s7 + $0x78] sm:$0xff]  ;;  %v316_v29 = vmul.f32 %v1425_v17, %v1425_v17  ;;  %v325_v31 = vmul.f32 %v1433_v19, %v1433_v19  ;;  %v319_v34 = vmul.f32 %v1444_v22, %v1444_v22 }
  0x19   : > { %281 = vadd.xlane.f32.xlu1 %v1382_v2  ;;  %v1458_v26 = vld [vmem:[%s1371_s7 + $0x70] sm:$0xff]  ;;  %v324_v32 = vmul.f32 %v1436_v20, %v1436_v20  ;;  %v318_v35 = vmul.f32 %v1447_v23, %v1447_v23  ;;  %v327_v37 = vmul.f32 %v1455_v25, %v1455_v25 }
  0x1a   : > { %265 = vadd.xlane.f32.xlu0 %v1385_v3  ;;  %1045 = vmatpush3.bf16.msra.mxu0 %v1178_v24  ;;  %v326_v38 = vmul.f32 %v1458_v26, %v1458_v26 }
  0x1b   : > { %1082 = vmatpush3.bf16.msra.mxu1 %v1178_v24  ;;  %1046 = vmatprep.subr.bf16.mxu0 %v1179_v27 }
  0x1c   : > { %1075 = vmatprep.subr.bf16.mxu1 %v1179_v27 }
  0x1d   : > { %269 = vadd.xlane.f32.xlu1 %v1390_v4 }
  0x1e   : > { %267 = vadd.xlane.f32.xlu0 %v1393_v5  ;;  %1047 = vmatpush3.bf16.msra.mxu0 %v1179_v27 }
  0x1f   : > { %1083 = vmatpush3.bf16.msra.mxu1 %v1179_v27  ;;  %1048 = vmatprep.subr.bf16.mxu0 %v1180_v30 }
  0x20   : > { %1076 = vmatprep.subr.bf16.mxu1 %v1180_v30 }
  0x21   : > { %285 = vadd.xlane.f32.xlu1 %v1398_v6 }
  0x22   : > { %283 = vadd.xlane.f32.xlu0 %v1401_v7  ;;  %1049 = vmatpush3.bf16.msra.mxu0 %v1180_v30 }
  0x23   : > { %1084 = vmatpush3.bf16.msra.mxu1 %v1180_v30  ;;  %1050 = vmatprep.subr.bf16.mxu0 %v1181_v33 }
  0x24   : > { %1077 = vmatprep.subr.bf16.mxu1 %v1181_v33 }
  0x25   : > { %330 = vadd.xlane.f32.xlu1 %v313_v8 }
  0x26   : > { %328 = vadd.xlane.f32.xlu0 %v312_v9  ;;  %1051 = vmatpush3.bf16.msra.mxu0 %v1181_v33 }
  0x27   : > { %1085 = vmatpush3.bf16.msra.mxu1 %v1181_v33  ;;  %1052 = vmatprep.subr.bf16.mxu0 %v1182_v36 }
  0x28   : > { %1078 = vmatprep.subr.bf16.mxu1 %v1182_v36 }
  0x29   : > { %346 = vadd.xlane.f32.xlu1 %v321_v10 }
  0x2a   : > { %344 = vadd.xlane.f32.xlu0 %v320_v11  ;;  %1053 = vmatpush3.bf16.msra.mxu0 %v1182_v36 }
  0x2b   : > { %1086 = vmatpush3.bf16.msra.mxu1 %v1182_v36  ;;  %1054 = vmatprep.subr.bf16.mxu0 %v1183_v39 }
  0x2c   : > { %1079 = vmatprep.subr.bf16.mxu1 %v1183_v39 }
  0x2d   : > { %334 = vadd.xlane.f32.xlu1 %v315_v12 }
  0x2e   : > { %332 = vadd.xlane.f32.xlu0 %v314_v13  ;;  %1055 = vmatpush3.bf16.msra.mxu0 %v1183_v39 }
  0x2f   : > { %1087 = vmatpush3.bf16.msra.mxu1 %v1183_v39 }
  0x31   : > { %350 = vadd.xlane.f32.xlu1 %v323_v14 }
  0x32   : > { %348 = vadd.xlane.f32.xlu0 %v322_v15 }
  0x35   : > { %273 = vadd.xlane.f32.xlu1 %v1422_v16 }
  0x36   : > { %271 = vadd.xlane.f32.xlu0 %v1425_v17 }
  0x39   : > { %289 = vadd.xlane.f32.xlu1 %v1433_v19 }
  0x3a   : > { %287 = vadd.xlane.f32.xlu0 %v1436_v20 }
  0x3d   : > { %277 = vadd.xlane.f32.xlu1 %v1444_v22 }
  0x3e   : > { %275 = vadd.xlane.f32.xlu0 %v1447_v23 }
  0x41   : > { %293 = vadd.xlane.f32.xlu1 %v1455_v25 }
  0x42   : > { %291 = vadd.xlane.f32.xlu0 %v1458_v26 }
  0x45   : > { %338 = vadd.xlane.f32.xlu1 %v317_v28 }
  0x46   : > { %336 = vadd.xlane.f32.xlu0 %v316_v29 }
  0x49   : > { %354 = vadd.xlane.f32.xlu1 %v325_v31 }
  0x4a   : > { %352 = vadd.xlane.f32.xlu0 %v324_v32 }
  0x4d   : > { %342 = vadd.xlane.f32.xlu1 %v319_v34 }
  0x4e   : > { %340 = vadd.xlane.f32.xlu0 %v318_v35 }
  0x51   : > { %358 = vadd.xlane.f32.xlu1 %v327_v37 }
  0x52   : > { %356 = vadd.xlane.f32.xlu0 %v326_v38 }
  0x9e   : > { %v280_v40 = vpop.xlane.xlu1 %279 }
  0x9f   : > { %v264_v41 = vpop.xlane.xlu0 %263  ;;  %v1497_v50 = vmul.f32 0.0078125, %v280_v40 }
  0xa0   : > { %v1493_v48 = vmul.f32 0.0078125, %v264_v41 }
  0xa1   : > { %v384_v61 = vmul.f32 %v1497_v50, %v1497_v50 }
  0xa2   : > { %v282_v42 = vpop.xlane.xlu1 %281  ;;  %v376_v54 = vmul.f32 %v1493_v48, %v1493_v48 }
  0xa3   : > { %v266_v43 = vpop.xlane.xlu0 %265  ;;  %v1499_v51 = vmul.f32 0.0078125, %v282_v42 }
  0xa4   : > { %v1495_v49 = vmul.f32 0.0078125, %v266_v43 }
  0xa5   : > { %v385_v62 = vmul.f32 %v1499_v51, %v1499_v51 }
  0xa6   : > { %v270_v44 = vpop.xlane.xlu1 %269  ;;  %v377_v55 = vmul.f32 %v1495_v49, %v1495_v49 }
  0xa7   : > { %v268_v45 = vpop.xlane.xlu0 %267  ;;  %v1505_v58 = vmul.f32 0.0078125, %v270_v44 }
  0xa8   : > { %v1511_v63 = vmul.f32 0.0078125, %v268_v45 }
  0xa9   : > { %v379_v14 = vmul.f32 %v1505_v58, %v1505_v58 }
  0xaa   : > { %v286_v46 = vpop.xlane.xlu1 %285  ;;  %v378_v21 = vmul.f32 %v1511_v63, %v1511_v63 }
  0xab   : > { %v284_v47 = vpop.xlane.xlu0 %283  ;;  %v1517_v24 = vmul.f32 0.0078125, %v286_v46 }
  0xac   : > { %v1519_v27 = vmul.f32 0.0078125, %v284_v47 }
  0xad   : > { %v387_v36 = vmul.f32 %v1517_v24, %v1517_v24 }
  0xae   : > { %v331_v52 = vpop.xlane.xlu1 %330  ;;  %v386_v37 = vmul.f32 %v1519_v27, %v1519_v27 }
  0xaf   : > { %v329_v53 = vpop.xlane.xlu0 %328  ;;  %v361_v56 = vmul.f32 0.0078125, %v331_v52 }
  0xb0   : > { %v360_v57 = vmul.f32 0.0078125, %v329_v53 }
  0xb1   : > { %v393_v59 = vsub.f32 %v361_v56, %v377_v55 }
  0xb2   : > { %v392_v60 = vsub.f32 %v360_v57, %v376_v54  ;;  %v347_v8 = vpop.xlane.xlu1 %346  ;;  %v1528_v54 = vld [vmem:[%s1754_s1] ss:$0 sm:$0xff] }
  0xb3   : > { %v345_v9 = vpop.xlane.xlu0 %344  ;;  %v409_v10 = vadd.f32 1e-05, %v393_v59  ;;  %v369_v12 = vmul.f32 0.0078125, %v347_v8 }
  0xb4   : > { %v408_v11 = vadd.f32 1e-05, %v392_v60  ;;  %v368_v13 = vmul.f32 0.0078125, %v345_v9  ;;  %v1539_v9 = vld [vmem:[%s1755_s2] ss:$0 sm:$0xff] }
  0xb5   : > { %1184 = vrsqrt.f32 %v409_v10  ;;  %v401_v15 = vsub.f32 %v369_v12, %v385_v62  ;;  %v443_v62 = vsub.f32 %v1385_v3, %v1495_v49  ;;  %v451_v3 = vsub.f32 %v1382_v2, %v1499_v51 }
  0xb6   : > { %v400_v18 = vsub.f32 %v368_v13, %v384_v61  ;;  %1186 = vrsqrt.f32 %v408_v11  ;;  %v335_v28 = vpop.xlane.xlu1 %334  ;;  %v442_v61 = vsub.f32 %v1377_v1, %v1493_v48  ;;  %v444_v51 = vsub.f32 %v1393_v5, %v1511_v63 }
  0xb7   : > { %v333_v29 = vpop.xlane.xlu0 %332  ;;  %v417_v30 = vadd.f32 1e-05, %v401_v15  ;;  %v363_v32 = vmul.f32 0.0078125, %v335_v28 }
  0xb8   : > { %v416_v31 = vadd.f32 1e-05, %v400_v18  ;;  %v362_v33 = vmul.f32 0.0078125, %v333_v29  ;;  %v450_v18 = vsub.f32 %v1374_v0, %v1497_v50  ;;  %v445_v50 = vsub.f32 %v1390_v4, %v1505_v58 }
  0xb9   : > { %1188 = vrsqrt.f32 %v417_v30  ;;  %v395_v34 = vsub.f32 %v363_v32, %v379_v14  ;;  %v452_v4 = vsub.f32 %v1401_v7, %v1519_v27 }
  0xba   : > { %v394_v35 = vsub.f32 %v362_v33, %v378_v21  ;;  %1190 = vrsqrt.f32 %v416_v31  ;;  %v351_v38 = vpop.xlane.xlu1 %350 }
  0xbb   : > { %v349_v39 = vpop.xlane.xlu0 %348  ;;  %v411_v40 = vadd.f32 1e-05, %v395_v34  ;;  %v371_v42 = vmul.f32 0.0078125, %v351_v38 }
  0xbc   : > { %v410_v41 = vadd.f32 1e-05, %v394_v35  ;;  %v370_v43 = vmul.f32 0.0078125, %v349_v39  ;;  %v453_v39 = vsub.f32 %v1398_v6, %v1517_v24 }
  0xbd   : > { %1192 = vrsqrt.f32 %v411_v40  ;;  %v403_v44 = vsub.f32 %v371_v42, %v387_v36 }
  0xbe   : > { %v402_v45 = vsub.f32 %v370_v43, %v386_v37  ;;  %1194 = vrsqrt.f32 %v410_v41  ;;  %v274_v46 = vpop.xlane.xlu1 %273 }
  0xbf   : > { %v272_v47 = vpop.xlane.xlu0 %271  ;;  %v419_v52 = vadd.f32 1e-05, %v403_v44  ;;  %v1549_v28 = vmul.f32 0.0078125, %v274_v46 }
  0xc0   : > { %v418_v53 = vadd.f32 1e-05, %v402_v45  ;;  %v1553_v35 = vmul.f32 0.0078125, %v272_v47 }
  0xc1   : > { %1196 = vrsqrt.f32 %v419_v52  ;;  %v381_v58 = vmul.f32 %v1549_v28, %v1549_v28 }
  0xc2   : > { %v1185_v55 = vpop.eup %1184  ;;  %1198 = vrsqrt.f32 %v418_v53  ;;  %v290_v56 = vpop.xlane.xlu1 %289  ;;  %v380_v6 = vmul.f32 %v1553_v35, %v1553_v35 }
  0xc3   : > { %v288_v57 = vpop.xlane.xlu0 %287  ;;  %v1187_v59 = vpop.eup %1186  ;;  %v465_v60 = vmul.f32 %v1185_v55, %v1528_v54  ;;  %v1567_v40 = vmul.f32 0.0078125, %v290_v56 }
  0xc4   : > { %v464_v8 = vmul.f32 %v1187_v59, %v1528_v54  ;;  %v1569_v5 = vmul.f32 0.0078125, %v288_v57 }
  0xc5   : > { %v481_v14 = vmul.f32 %v465_v60, %v443_v62 }
  0xc6   : > { %v1189_v10 = vpop.eup %1188  ;;  %v278_v11 = vpop.xlane.xlu1 %277  ;;  %v480_v13 = vmul.f32 %v464_v8, %v442_v61  ;;  %v389_v61 = vmul.f32 %v1567_v40, %v1567_v40  ;;  %v388_v62 = vmul.f32 %v1569_v5, %v1569_v5 }
  0xc7   : > { %v276_v12 = vpop.xlane.xlu0 %275  ;;  %v1191_v15 = vpop.eup %1190  ;;  %v473_v1 = vmul.f32 %v1189_v10, %v1528_v54  ;;  %v503_v49 = vadd.f32 %v1539_v9, %v481_v14  ;;  %v1574_v27 = vmul.f32 0.0078125, %v278_v11 }
  0xc8   : > { %v502_v48 = vadd.f32 %v1539_v9, %v480_v13  ;;  %v472_v21 = vmul.f32 %v1191_v15, %v1528_v54  ;;  %v1579_v56 = vmul.f32 0.0078125, %v276_v12 }
  0xc9   : > { %v489_v34 = vmul.f32 %v473_v1, %v451_v3  ;;  %v383_v12 = vmul.f32 %v1574_v27, %v1574_v27 }
  0xca   : > { %v1193_v29 = vpop.eup %1192  ;;  %v294_v30 = vpop.xlane.xlu1 %293  ;;  %v518_v32 = vpack.c.bf16 %v503_v49, %v502_v48  ;;  %v488_v33 = vmul.f32 %v472_v21, %v450_v18  ;;  %v382_v49 = vmul.f32 %v1579_v56, %v1579_v56 }
  0xcb   : > { %v292_v31 = vpop.xlane.xlu0 %291  ;;  %v1195_v0 = vpop.eup %1194  ;;  %v467_v2 = vmul.f32 %v1193_v29, %v1528_v54  ;;  %v511_v37 = vadd.f32 %v1539_v9, %v489_v34 }
  0xcc   : > { %1056 = vmatprep.mubr.bf16.mxu0 %v518_v32  ;;  %v510_v36 = vadd.f32 %v1539_v9, %v488_v33  ;;  %v466_v38 = vmul.f32 %v1195_v0, %v1528_v54  ;;  %v1591_v32 = vmul.f32 0.0078125, %v294_v30  ;;  %v1593_v33 = vmul.f32 0.0078125, %v292_v31 }
  0xcd   : > { %v483_v45 = vmul.f32 %v467_v2, %v445_v50 }
  0xce   : > { %v1197_v41 = vpop.eup %1196  ;;  %v339_v63 = vpop.xlane.xlu1 %338  ;;  %v522_v43 = vpack.c.bf16 %v511_v37, %v510_v36  ;;  %v482_v44 = vmul.f32 %v466_v38, %v444_v51  ;;  %v390_v30 = vmul.f32 %v1593_v33, %v1593_v33 }
  0xcf   : > { %v337_v42 = vpop.xlane.xlu0 %336  ;;  %v1199_v46 = vpop.eup %1198  ;;  %v365_v24 = vmul.f32 0.0078125, %v339_v63  ;;  %v475_v7 = vmul.f32 %v1197_v41, %v1528_v54  ;;  %v505_v53 = vadd.f32 %v1539_v9, %v483_v45 }
  0xd0   : > { %v364_v47 = vmul.f32 0.0078125, %v337_v42  ;;  %1064 = vmatprep.mubr.bf16.mxu1 %v522_v43  ;;  %v504_v52 = vadd.f32 %v1539_v9, %v482_v44  ;;  %v474_v55 = vmul.f32 %v1199_v46, %v1528_v54 }
  0xd1   : > { %v397_v57 = vsub.f32 %v365_v24, %v381_v58  ;;  %v491_v60 = vmul.f32 %v475_v7, %v453_v39  ;;  %v447_v7 = vsub.f32 %v1422_v16, %v1549_v28  ;;  %v454_v16 = vsub.f32 %v1436_v20, %v1569_v5 }
  0xd2   : > { %v396_v59 = vsub.f32 %v364_v47, %v380_v6  ;;  %v355_v8 = vpop.xlane.xlu1 %354  ;;  %v519_v11 = vpack.c.bf16 %v505_v53, %v504_v52  ;;  %v490_v13 = vmul.f32 %v474_v55, %v452_v4  ;;  %v391_v4 = vmul.f32 %v1591_v32, %v1591_v32 }
  0xd3   : > { %v353_v10 = vpop.xlane.xlu0 %352  ;;  %v413_v14 = vadd.f32 1e-05, %v397_v57  ;;  %v373_v18 = vmul.f32 0.0078125, %v355_v8  ;;  %v513_v48 = vadd.f32 %v1539_v9, %v491_v60  ;;  %v446_v53 = vsub.f32 %v1425_v17, %v1553_v35 }
  0xd4   : > { %v412_v15 = vadd.f32 1e-05, %v396_v59  ;;  %v372_v1 = vmul.f32 0.0078125, %v353_v10  ;;  %1057 = vmatmul.mubr.bf16.vlgmr.msra.gmra.mxu0 %v519_v11  ;;  %v512_v3 = vadd.f32 %v1539_v9, %v490_v13 }
  0xd5   : > { %1200 = vrsqrt.f32 %v413_v14  ;;  %v405_v21 = vsub.f32 %v373_v18, %v389_v61  ;;  %v449_v18 = vsub.f32 %v1444_v22, %v1574_v27  ;;  %v457_v22 = vsub.f32 %v1455_v25, %v1591_v32 }
  0xd6   : > { %v404_v29 = vsub.f32 %v372_v1, %v388_v62  ;;  %1202 = vrsqrt.f32 %v412_v15  ;;  %v343_v34 = vpop.xlane.xlu1 %342  ;;  %v523_v50 = vpack.c.bf16 %v513_v48, %v512_v3  ;;  %v455_v62 = vsub.f32 %v1433_v19, %v1567_v40 }
  0xd7   : > { %v341_v0 = vpop.xlane.xlu0 %340  ;;  %v421_v2 = vadd.f32 1e-05, %v405_v21  ;;  %v367_v36 = vmul.f32 0.0078125, %v343_v34  ;;  %v448_v1 = vsub.f32 %v1447_v23, %v1579_v56  ;;  %v456_v23 = vsub.f32 %v1458_v26, %v1593_v33  ;;  %v995_v26 = vld [vmem:[%s1757_s4] ss:$0 sm:$0xff] }
  0xd8   : > { %v420_v51 = vadd.f32 1e-05, %v404_v29  ;;  %v366_v37 = vmul.f32 0.0078125, %v341_v0  ;;  %1065 = vmatmul.mubr.bf16.vlgmr.msra.gmra.mxu1 %v523_v50 }
  0xd9   : > { %1204 = vrsqrt.f32 %v421_v2  ;;  %v399_v38 = vsub.f32 %v367_v36, %v383_v12 }
  0xda   : > { %v398_v39 = vsub.f32 %v366_v37, %v382_v49  ;;  %1206 = vrsqrt.f32 %v420_v51  ;;  %v359_v31 = vpop.xlane.xlu1 %358 }
  0xdb   : > { %v357_v58 = vpop.xlane.xlu0 %356  ;;  %v415_v41 = vadd.f32 1e-05, %v399_v38  ;;  %v375_v42 = vmul.f32 0.0078125, %v359_v31 }
  0xdc   : > { %v414_v63 = vadd.f32 1e-05, %v398_v39  ;;  %v374_v43 = vmul.f32 0.0078125, %v357_v58 }
  0xdd   : > { %1208 = vrsqrt.f32 %v415_v41  ;;  %v407_v44 = vsub.f32 %v375_v42, %v391_v4 }
  0xde   : > { %v406_v45 = vsub.f32 %v374_v43, %v390_v30  ;;  %1210 = vrsqrt.f32 %v414_v63 }
  0xdf   : > { %v423_v46 = vadd.f32 1e-05, %v407_v44 }
  0xe0   : > { %v422_v6 = vadd.f32 1e-05, %v406_v45 }
  0xe1   : > { %1212 = vrsqrt.f32 %v423_v46 }
  0xe2   : > { %v1201_v24 = vpop.eup %1200  ;;  %1214 = vrsqrt.f32 %v422_v6 }
  0xe3   : > { %v1203_v47 = vpop.eup %1202  ;;  %v469_v52 = vmul.f32 %v1201_v24, %v1528_v54 }
  0xe4   : > { %v468_v55 = vmul.f32 %v1203_v47, %v1528_v54 }
  0xe5   : > { %v485_v57 = vmul.f32 %v469_v52, %v447_v7 }
  0xe6   : > { %v1205_v59 = vpop.eup %1204  ;;  %v484_v60 = vmul.f32 %v468_v55, %v446_v53 }
  0xe7   : > { %v1207_v61 = vpop.eup %1206  ;;  %v507_v8 = vadd.f32 %v1539_v9, %v485_v57  ;;  %v477_v10 = vmul.f32 %v1205_v59, %v1528_v54 }
  0xe8   : > { %v506_v28 = vadd.f32 %v1539_v9, %v484_v60  ;;  %v476_v17 = vmul.f32 %v1207_v61, %v1528_v54 }
  0xe9   : > { %v493_v35 = vmul.f32 %v477_v10, %v455_v62 }
  0xea   : > { %v1209_v11 = vpop.eup %1208  ;;  %v520_v13 = vpack.c.bf16 %v507_v8, %v506_v28  ;;  %v492_v14 = vmul.f32 %v476_v17, %v454_v16 }
  0xeb   : > { %v1211_v15 = vpop.eup %1210  ;;  %v515_v19 = vadd.f32 %v1539_v9, %v493_v35  ;;  %v471_v40 = vmul.f32 %v1209_v11, %v1528_v54 }
  0xec   : > { %1060 = vmatprep.mubr.bf16.mxu0 %v520_v13  ;;  %v514_v20 = vadd.f32 %v1539_v9, %v492_v14  ;;  %v470_v5 = vmul.f32 %v1211_v15, %v1528_v54 }
  0xed   : > { %v487_v12 = vmul.f32 %v471_v40, %v449_v18 }
  0xee   : > { %v1213_v3 = vpop.eup %1212  ;;  %v524_v48 = vpack.c.bf16 %v515_v19, %v514_v20  ;;  %v486_v49 = vmul.f32 %v470_v5, %v448_v1 }
  0xef   : > { %v1215_v21 = vpop.eup %1214  ;;  %v509_v27 = vadd.f32 %v1539_v9, %v487_v12  ;;  %v479_v29 = vmul.f32 %v1213_v3, %v1528_v54 }
  0xf0   : > { %1068 = vmatprep.mubr.bf16.mxu1 %v524_v48  ;;  %v508_v56 = vadd.f32 %v1539_v9, %v486_v49  ;;  %v478_v34 = vmul.f32 %v1215_v21, %v1528_v54 }
  0xf1   : > { %v495_v0 = vmul.f32 %v479_v29, %v457_v22 }
  0xf2   : > { %v521_v50 = vpack.c.bf16 %v509_v27, %v508_v56  ;;  %v494_v2 = vmul.f32 %v478_v34, %v456_v23 }
  0xf3   : > { %v517_v51 = vadd.f32 %v1539_v9, %v495_v0 }
  0xf4   : > { %1061 = vmatmul.mubr.bf16.gmra.mxu0 %v521_v50  ;;  %v516_v25 = vadd.f32 %v1539_v9, %v494_v2 }
  0xf6   : > { %v525_v32 = vpack.c.bf16 %v517_v51, %v516_v25 }
  0xf8   : > { %1069 = vmatmul.mubr.bf16.gmra.mxu1 %v525_v32 }
 0x194   : > { %v1058_v33 = vpop.f32.mrf.mxu0 }
 0x195   : > { %v640_v36 = vadd.f32 %v1058_v33, %v995_v26 }
 0x196   : > { %v631_v37 = vpop.f32.mrf.mxu0 }
 0x197   : > { %696 = vst [vmem:[%s1635_s14 + $0x10] sm:$0xff] %v640_v36  ;;  %v632_v54 = vadd.f32 %v995_v26, %v631_v37 }
 0x198   : > { %v1059_v9 = vpop.f32.mrf.mxu0  ;;  %v1066_v38 = vpop.f32.mrf.mxu1 }
 0x199   : > { %694 = vst [vmem:[%s1635_s14] sm:$0xff] %v632_v54  ;;  %v643_v39 = vadd.f32 %v1059_v9, %v995_v26  ;;  %v672_v4 = vadd.f32 %v1066_v38, %v995_v26 }
 0x19a   : > { %v634_v30 = vpop.f32.mrf.mxu0  ;;  %v663_v31 = vpop.f32.mrf.mxu1 }
 0x19b   : > { %697 = vst [vmem:[%s1635_s14 + $0x18] sm:$0xff] %v643_v39  ;;  %704 = vst [vmem:[%s1635_s14 + $0x50] sm:$0xff] %v672_v4  ;;  %v635_v58 = vadd.f32 %v995_v26, %v634_v30  ;;  %v664_v41 = vadd.f32 %v995_v26, %v663_v31 }
 0x19c   : > { %v1067_v63 = vpop.f32.mrf.mxu1 }
 0x19d   : > { %695 = vst [vmem:[%s1635_s14 + $0x8] sm:$0xff] %v635_v58  ;;  %702 = vst [vmem:[%s1635_s14 + $0x40] sm:$0xff] %v664_v41  ;;  %v675_v42 = vadd.f32 %v1067_v63, %v995_v26 }
 0x19e   : > { %v666_v43 = vpop.f32.mrf.mxu1 }
 0x19f   : > { %705 = vst [vmem:[%s1635_s14 + $0x58] sm:$0xff] %v675_v42  ;;  %v667_v44 = vadd.f32 %v995_v26, %v666_v43 }
 0x1a1   : > { %703 = vst [vmem:[%s1635_s14 + $0x48] sm:$0xff] %v667_v44 }
 0x1b4   : > { %v1062_v45 = vpop.f32.mrf.mxu0 }
 0x1b5   : > { %v656_v46 = vadd.f32 %v1062_v45, %v995_v26 }
 0x1b6   : > { %v647_v6 = vpop.f32.mrf.mxu0 }
 0x1b7   : > { %700 = vst [vmem:[%s1635_s14 + $0x30] sm:$0xff] %v656_v46  ;;  %v648_v24 = vadd.f32 %v995_v26, %v647_v6 }
 0x1b8   : > { %v1063_v47 = vpop.f32.mrf.mxu0  ;;  %v1070_v7 = vpop.f32.mrf.mxu1 }
 0x1b9   : > { %698 = vst [vmem:[%s1635_s14 + $0x20] sm:$0xff] %v648_v24  ;;  %v659_v52 = vadd.f32 %v1063_v47, %v995_v26  ;;  %v688_v53 = vadd.f32 %v1070_v7, %v995_v26 }
 0x1ba   : > { %v650_v55 = vpop.f32.mrf.mxu0  ;;  %v679_v57 = vpop.f32.mrf.mxu1 }
 0x1bb   : > { %701 = vst [vmem:[%s1635_s14 + $0x38] sm:$0xff] %v659_v52  ;;  %708 = vst [vmem:[%s1635_s14 + $0x70] sm:$0xff] %v688_v53  ;;  %v651_v59 = vadd.f32 %v995_v26, %v650_v55  ;;  %v680_v60 = vadd.f32 %v995_v26, %v679_v57 }
 0x1bc   : > { %v1071_v61 = vpop.f32.mrf.mxu1 }
 0x1bd   : > { %699 = vst [vmem:[%s1635_s14 + $0x28] sm:$0xff] %v651_v59  ;;  %706 = vst [vmem:[%s1635_s14 + $0x60] sm:$0xff] %v680_v60  ;;  %v691_v62 = vadd.f32 %v1071_v61, %v995_v26  ;;  %716 = sbr.rel (!%p1359_p4) target bundleno = 491 (0x1eb), region = 44 }
 0x1be   : > { %v682_v8 = vpop.f32.mrf.mxu1 }
 0x1bf   : > { %709 = vst [vmem:[%s1635_s14 + $0x78] sm:$0xff] %v691_v62  ;;  %v683_v10 = vadd.f32 %v995_v26, %v682_v8 }
 0x1c1   : > { %707 = vst [vmem:[%s1635_s14 + $0x68] sm:$0xff] %v683_v10 }
 0x1c2   : > { %s1767_s18 = smov (!%p719_p8, %s718_s18), 16 }
 0x1c3   : > { %s1006_s23 = sshll.u32 %s1767_s18, 7 }
 0x1c4   : > { %p1009_p9 = scmp.eq.s32.totalorder %s1006_s23, 0 }
 0x1c5   : > { %s1666_s24 = sshrl.u32 (!%p1009_p9), %s1767_s18, 4 }
 0x1c6   : > { %727 = sbr.rel (%p1009_p9) target bundleno = 491 (0x1eb), region = 48  ;;  %p1010_p10 = scmp.le.s32.totalorder (!%p1009_p9), %s1666_s24, 0 }
 0x1cb   : > { %942 = sbr.rel (%p1010_p10) target bundleno = 474 (0x1da), region = 124  ;;  %s1760_s21 = smov (!%p1010_p10), %s1660_s20 }
 0x1cc   : > { %s1761_s26 = smov (!%p1010_p10), %s1635_s14  ;;  %s1675_s27 = smov (!%p1010_p10), 0  }
 0x1cd   : > { %s1677_s28 = smov (!%p1010_p10), 0  }
 0x1d0 LB: >> { %v820_v16 = vld [vmem:[%s1278_s26] sm:$0xff]  ;;  %v822_v28 = vld [vmem:[%s1278_s26 + $0x8] sm:$0xff]  ;;  %v824_v17 = vld [vmem:[%s1278_s26 + $0x10] sm:$0xff]  ;;  %s852_s29 = sadd.s32 1, %s1282_s27  ;;  %s814_s28 = sadd.s32 1, %s1286_s28   ;;  %s1286_s28 = sphi %s1677_s28, %s814_s28   ;;  %s1282_s27 = sphi %s1675_s27, %s1762_s27   ;;  %s1278_s26 = sphi %s1761_s26, %s857_s26   ;;  %s1274_s21 = sphi %s1760_s21, %s858_s21  }
 0x1d1   : >> { %821 = vst [vmem:[%s1274_s21] sm:$0xff] %v820_v16  ;;  %823 = vst [vmem:[%s1274_s21 + $0x8] sm:$0xff] %v822_v28  ;;  %v826_v35 = vld [vmem:[%s1278_s26 + $0x18] sm:$0xff]  ;;  %v828_v11 = vld [vmem:[%s1278_s26 + $0x20] sm:$0xff]  ;;  %p853_p11 = scmp.ge.s32.totalorder %s852_s29, %s1666_s24  ;;  %p813_p12 = scmp.ge.s32.totalorder %s814_s28, %s1666_s24 }
 0x1d2   : >> { %825 = vst [vmem:[%s1274_s21 + $0x10] sm:$0xff] %v824_v17  ;;  %v830_v13 = vld [vmem:[%s1278_s26 + $0x28] sm:$0xff]  ;;  %827 = vst [vmem:[%s1274_s21 + $0x18] sm:$0xff] %v826_v35  ;;  %v832_v14 = vld [vmem:[%s1278_s26 + $0x30] sm:$0xff] }
 0x1d3   : >> { %829 = vst [vmem:[%s1274_s21 + $0x20] sm:$0xff] %v828_v11  ;;  %831 = vst [vmem:[%s1274_s21 + $0x28] sm:$0xff] %v830_v13  ;;  %v834_v15 = vld [vmem:[%s1278_s26 + $0x38] sm:$0xff]  ;;  %v836_v18 = vld [vmem:[%s1278_s26 + $0x40] sm:$0xff]  ;;  %s1769_s29 = smov (%p853_p11, %s852_s29), 0 }
 0x1d4   : >> { %833 = vst [vmem:[%s1274_s21 + $0x30] sm:$0xff] %v832_v14  ;;  %835 = vst [vmem:[%s1274_s21 + $0x38] sm:$0xff] %v834_v15  ;;  %v838_v19 = vld [vmem:[%s1278_s26 + $0x48] sm:$0xff]  ;;  %v840_v40 = vld [vmem:[%s1278_s26 + $0x50] sm:$0xff]  ;;  %s1011_s30 = sshll.u32 %s1769_s29, 7  ;;  %s1762_s27 = smov %s1769_s29 }
 0x1d5   : >> { %837 = vst [vmem:[%s1274_s21 + $0x40] sm:$0xff] %v836_v18  ;;  %v842_v1 = vld [vmem:[%s1278_s26 + $0x58] sm:$0xff]  ;;  %839 = vst [vmem:[%s1274_s21 + $0x48] sm:$0xff] %v838_v19  ;;  %v844_v20 = vld [vmem:[%s1278_s26 + $0x60] sm:$0xff]  ;;  %816 = sbr.rel (!%p813_p12) target bundleno = 464 (0x1d0), region = 130 }
 0x1d6   : >> { %841 = vst [vmem:[%s1274_s21 + $0x50] sm:$0xff] %v840_v40  ;;  %843 = vst [vmem:[%s1274_s21 + $0x58] sm:$0xff] %v842_v1  ;;  %v846_v5 = vld [vmem:[%s1278_s26 + $0x68] sm:$0xff]  ;;  %v848_v12 = vld [vmem:[%s1278_s26 + $0x70] sm:$0xff] }
 0x1d7   : >> { %845 = vst [vmem:[%s1274_s21 + $0x60] sm:$0xff] %v844_v20  ;;  %847 = vst [vmem:[%s1274_s21 + $0x68] sm:$0xff] %v846_v5  ;;  %v850_v3 = vld [vmem:[%s1278_s26 + $0x78] sm:$0xff]  ;;  %s857_s26 = scalar_lea.vmem %s1635_s14, %s1011_s30 [#allocation2]  }
 0x1d8   : >> { %849 = vst [vmem:[%s1274_s21 + $0x70] sm:$0xff] %v848_v12  ;;  %851 = vst [vmem:[%s1274_s21 + $0x78] sm:$0xff] %v850_v3  ;;  %s858_s21 = scalar_lea.vmem %s1660_s20, %s1011_s30  }
 0x1da PF: > { %s1735_s6 = sand.u32 15, %s1767_s18   ;;  %s1022_s7 = sshll.u32 %s1666_s24, 7 }
 0x1db   : > { %s863_s8 = scalar_lea.vmem %s1635_s14, %s1022_s7 [#allocation2]   ;;  %s865_s9 = scalar_lea.vmem %s1660_s20, %s1022_s7  }
 0x1dc   : > { %p1016_p13 = scmp.le.s32.totalorder %s1735_s6, 0 }
 0x1dd   : > { %s1288_s10 = smov (!%p1016_p13), %s865_s9   ;;  %s1292_s11 = smov (!%p1016_p13), %s863_s8  }
 0x1de   : > { %956 = sbr.rel (%p1016_p13) target bundleno = 491 (0x1eb), region = 135  ;;  %s1296_s12 = smov (!%p1016_p13), 0  }
 0x1df   : > { %s1300_s13 = smov (!%p1016_p13), 0  }
 0x1e3 LB: >> { %v875_v48 = vld [vmem:[%s1294_s11] sm:$0xff]  ;;  %s877_s18 = sadd.s32 1, %s1298_s12  ;;  %s869_s13 = sadd.s32 1, %s1302_s13   ;;  %s1302_s13 = sphi %s1300_s13, %s869_s13   ;;  %s1298_s12 = sphi %s1296_s12, %s1297_s12   ;;  %s1294_s11 = sphi %s1292_s11, %s882_s11   ;;  %s1290_s10 = sphi %s1288_s10, %s883_s10  }
 0x1e4   : >> { %876 = vst [vmem:[%s1290_s10] sm:$0xff] %v875_v48  ;;  %p878_p0 = scmp.ge.s32.totalorder %s877_s18, %s1735_s6  ;;  %p868_p1 = scmp.ge.s32.totalorder %s869_s13, %s1735_s6 }
 0x1e6   : >> { %s1771_s18 = smov (%p878_p0, %s877_s18), 0  ;;  %871 = sbr.rel (!%p868_p1) target bundleno = 483 (0x1e3), region = 141 }
 0x1e7   : >> { %s1017_s14 = sshll.u32 %s1771_s18, 3  ;;  %s1297_s12 = smov %s1771_s18  }
 0x1e8   : >> { %s882_s11 = scalar_lea.vmem %s863_s8, %s1017_s14 [#allocation2]   ;;  %s883_s10 = scalar_lea.vmem %s865_s9, %s1017_s14  }
 0x1eb PF: > { %p12_p2 = scmp.ge.s32.totalorder %s1349_s22, 4   ;;  %s1763_s18 = smov %s1266_s19 }
 0x1ec   : > { %s1764_s19 = smov %s1357_s25  ;;  %s1765_s20 = smov %s1349_s22 }
 0x1ed   :  { %14 = sbr.rel (!%p12_p2) target bundleno = 2 (0x2), region = 152 }

</bundles_post_ra>
